<compile_context>
chip_gen: v6e
topology: v6e:2x2x1
jax: 0.10.0
libtpu: 0.0.40
codegen_flags: <defaults>
</compile_context>

<pallas_src>
import jax
import jax.numpy as jnp
from jax.experimental import pallas as pl
from jax.experimental.pallas import tpu as pltpu


def decoder_kernel(x_ref, wih_ref, whh_ref, b_ref, wfc_ref, bfc_ref, out_ref):
    """Fused-gate LSTM (constant repeated input) + hoisted Linear, all in VMEM.

    x_ref   : (B, F)       repeated input features
    wih_ref : (F, 4H)      packed input weights, gate order (i, f, o, g)
    whh_ref : (H, 4H)      packed recurrent weights, gate order (i, f, o, g)
    b_ref   : (1, 4H)      packed bias (b_ih + b_hh), gate order (i, f, o, g)
    wfc_ref : (H, O)       Linear weight (transposed PyTorch fc.weight)
    bfc_ref : (1, O)       Linear bias
    out_ref : (B*S, O)     flattened batch_first output (reshaped in wrapper)
    """
    B = x_ref.shape[0]
    H = whh_ref.shape[0]
    S = out_ref.shape[0] // B

    x_val = x_ref[...]

    # Hoisted, time-invariant input contribution: one (B, 4H) tensor.
    x_gates = (jnp.dot(x_val, wih_ref[...], preferred_element_type=jnp.float32)
               + b_ref[...])                                      # (B, 4H)

    # Recurrent packed weight loaded once.
    w_hh = whh_ref[...]                                           # (H, 4H)

    h = jnp.zeros((B, H), jnp.float32)
    c = jnp.zeros((B, H), jnp.float32)

    # Fully unrolled serial recurrence; ONE matmul + 3 transcendentals / step.
    hs_list = []
    for _ in range(S):
        gates = x_gates + jnp.dot(h, w_hh,
                                  preferred_element_type=jnp.float32)  # (B, 4H)
        sig = jax.nn.sigmoid(gates[:, 0:3 * H])      # i | f | o  in one shot
        g_t = jnp.tanh(gates[:, 3 * H:4 * H])        # g
        i_t = sig[:, 0:H]
        f_t = sig[:, H:2 * H]
        o_t = sig[:, 2 * H:3 * H]
        c = f_t * c + i_t * g_t
        h = o_t * jnp.tanh(c)
        hs_list.append(h)

    # Hoisted fc: stack all h_t batch-major -> one (B*S, H) @ (H, O) matmul,
    # single contiguous store of the whole output slab.
    hs_flat = jnp.stack(hs_list, axis=1).reshape(B * S, H)        # (B*S, H)
    out_ref[...] = (jnp.dot(hs_flat, wfc_ref[...],
                            preferred_element_type=jnp.float32)
                    + bfc_ref[...])                               # (B*S, O)


def decoder_forward(x, params, seq_len):
    """x: (B, no_features) -> (B, seq_len, output_size)."""
    w_ih, w_hh, b_ih, b_hh, w_fc, b_fc = params
    B, F = x.shape
    H = w_hh.shape[1]            # PyTorch weight_hh: (4H, H)
    O = w_fc.shape[0]            # PyTorch fc.weight: (O, H)

    # Repack PyTorch-layout weights: gate order (i, f, g, o) -> (i, f, o, g),
    # fused into single (F, 4H) / (H, 4H) right-matmul matrices.
    gate_perm = [0, 1, 3, 2]
    wih_packed = (jnp.asarray(w_ih, jnp.float32)
                  .reshape(4, H, F)[gate_perm, :, :]
                  .reshape(4 * H, F).T)                            # (F, 4H)
    whh_packed = (jnp.asarray(w_hh, jnp.float32)
                  .reshape(4, H, H)[gate_perm, :, :]
                  .reshape(4 * H, H).T)                            # (H, 4H)
    b_packed = ((jnp.asarray(b_ih, jnp.float32)
                 + jnp.asarray(b_hh, jnp.float32))
                .reshape(4, H)[gate_perm, :]
                .reshape(1, 4 * H))                                # (1, 4H)
    wfc_t = jnp.asarray(w_fc, jnp.float32).T                       # (H, O)
    bfc2 = jnp.asarray(b_fc, jnp.float32).reshape(1, -1)           # (1, O)

    vmem = pltpu.MemorySpace.VMEM
    out_flat = pl.pallas_call(
        decoder_kernel,
        out_shape=jax.ShapeDtypeStruct((B * seq_len, O), jnp.float32),
        in_specs=[pl.BlockSpec(memory_space=vmem)] * 6,
        out_specs=pl.BlockSpec(memory_space=vmem),
    )(x.astype(jnp.float32), wih_packed, whh_packed, b_packed, wfc_t, bfc2)
    # Free metadata reshape to PyTorch batch_first layout.
    return out_flat.reshape(B, seq_len, O)


def decoder_reference(x, params, seq_len):
    """Pure-JAX reference mirroring the PyTorch forward semantics."""
    w_ih, w_hh, b_ih, b_hh, w_fc, b_fc = params
    H = w_hh.shape[1]
    B = x.shape[0]
    h = jnp.zeros((B, H), jnp.float32)
    c = jnp.zeros((B, H), jnp.float32)
    hs = []
    for _ in range(seq_len):
        gates = x @ w_ih.T + b_ih + h @ w_hh.T + b_hh
        i_g = jax.nn.sigmoid(gates[:, 0:H])
        f_g = jax.nn.sigmoid(gates[:, H:2 * H])
        g_g = jnp.tanh(gates[:, 2 * H:3 * H])
        o_g = jax.nn.sigmoid(gates[:, 3 * H:4 * H])
        c = f_g * c + i_g * g_g
        h = o_g * jnp.tanh(c)
        hs.append(h)
    hs = jnp.stack(hs, axis=1)           # (B, S, H)
    return hs @ w_fc.T + b_fc            # (B, S, O)


def init_params(key, no_features, hidden_size, output_size):
    """Deterministic synthetic parameters with PyTorch LSTM/Linear shapes."""
    k = jax.random.split(key, 6)
    s = 0.2
    w_ih = s * jax.random.normal(k[0], (4 * hidden_size, no_features), jnp.float32)
    w_hh = s * jax.random.normal(k[1], (4 * hidden_size, hidden_size), jnp.float32)
    b_ih = s * jax.random.normal(k[2], (4 * hidden_size,), jnp.float32)
    b_hh = s * jax.random.normal(k[3], (4 * hidden_size,), jnp.float32)
    w_fc = s * jax.random.normal(k[4], (output_size, hidden_size), jnp.float32)
    b_fc = s * jax.random.normal(k[5], (output_size,), jnp.float32)
    return (w_ih, w_hh, b_ih, b_hh, w_fc, b_fc)


if __name__ == "__main__":
    batch = 2
    seq_len = 8
    no_features = 4
    hidden_size = 2 * no_features   # 8
    output_size = 4

    key = jax.random.PRNGKey(0)
    kx, kp = jax.random.split(key)
    x = jax.random.normal(kx, (batch, no_features), jnp.float32)
    params = init_params(kp, no_features, hidden_size, output_size)

    out = decoder_forward(x, params, seq_len)
    out = jax.block_until_ready(out)

    ref = decoder_reference(x, params, seq_len)
    assert out.shape == (batch, seq_len, output_size)
    assert jnp.allclose(out, ref, rtol=1e-4, atol=1e-5), "mismatch vs reference"

    print("KERNEL_OK")
</pallas_src>

<mosaic_0001>
module attributes {stable_mosaic.version = 11 : i64} {
  func.func @decoder_kernel(%arg0: memref<2x4xf32, #tpu.memory_space<vmem>>, %arg1: memref<4x32xf32, #tpu.memory_space<vmem>>, %arg2: memref<8x32xf32, #tpu.memory_space<vmem>>, %arg3: memref<1x32xf32, #tpu.memory_space<vmem>>, %arg4: memref<8x4xf32, #tpu.memory_space<vmem>>, %arg5: memref<1x4xf32, #tpu.memory_space<vmem>>, %arg6: memref<16x4xf32, #tpu.memory_space<vmem>>) attributes {dimension_semantics = [], scalar_prefetch = 0 : i64, scratch_operands = 0 : i64, tpu.core_type = #tpu.core_type<tc>} {
    %c0 = arith.constant 0 : index
    %c0_0 = arith.constant 0 : index
    %0 = vector.load %arg0[%c0, %c0_0] : memref<2x4xf32, #tpu.memory_space<vmem>>, vector<2x4xf32>
    %c0_1 = arith.constant 0 : index
    %c0_2 = arith.constant 0 : index
    %1 = vector.load %arg1[%c0_1, %c0_2] : memref<4x32xf32, #tpu.memory_space<vmem>>, vector<4x32xf32>
    %cst = arith.constant dense<0.000000e+00> : vector<2x32xf32>
    %2 = tpu.matmul %0, %1, %cst {dimension_numbers = #tpu.dot_dimension_numbers<[1], [0], [0], [1], [0, 0, 1, 1], [], []>} : vector<2x4xf32>, vector<4x32xf32>, vector<2x32xf32> -> vector<2x32xf32>
    %c0_3 = arith.constant 0 : index
    %c0_4 = arith.constant 0 : index
    %3 = vector.load %arg3[%c0_3, %c0_4] : memref<1x32xf32, #tpu.memory_space<vmem>>, vector<1x32xf32>
    %4 = vector.broadcast %3 : vector<1x32xf32> to vector<2x32xf32>
    %5 = arith.addf %2, %4 : vector<2x32xf32>
    %c0_5 = arith.constant 0 : index
    %c0_6 = arith.constant 0 : index
    %6 = vector.load %arg2[%c0_5, %c0_6] : memref<8x32xf32, #tpu.memory_space<vmem>>, vector<8x32xf32>
    %cst_7 = arith.constant 0.000000e+00 : f32
    %7 = vector.broadcast %cst_7 : f32 to vector<2x8xf32>
    %cst_8 = arith.constant 0.000000e+00 : f32
    %8 = vector.broadcast %cst_8 : f32 to vector<2x8xf32>
    %cst_9 = arith.constant dense<0.000000e+00> : vector<2x32xf32>
    %9 = tpu.matmul %7, %6, %cst_9 {dimension_numbers = #tpu.dot_dimension_numbers<[1], [0], [0], [1], [0, 0, 1, 1], [], []>} : vector<2x8xf32>, vector<8x32xf32>, vector<2x32xf32> -> vector<2x32xf32>
    %10 = arith.addf %5, %9 : vector<2x32xf32>
    %11 = vector.extract_strided_slice %10 {offsets = [0, 0], sizes = [2, 24], strides = [1, 1]} : vector<2x32xf32> to vector<2x24xf32>
    %12 = arith.negf %11 : vector<2x24xf32>
    %13 = math.exp %12 : vector<2x24xf32>
    %cst_10 = arith.constant 1.000000e+00 : f32
    %14 = vector.broadcast %cst_10 : f32 to vector<2x24xf32>
    %15 = arith.addf %14, %13 : vector<2x24xf32>
    %16 = arith.divf %14, %15 : vector<2x24xf32>
    %17 = vector.extract_strided_slice %10 {offsets = [0, 24], sizes = [2, 8], strides = [1, 1]} : vector<2x32xf32> to vector<2x8xf32>
    %18 = math.tanh %17 : vector<2x8xf32>
    %19 = vector.extract_strided_slice %16 {offsets = [0, 0], sizes = [2, 8], strides = [1, 1]} : vector<2x24xf32> to vector<2x8xf32>
    %20 = vector.extract_strided_slice %16 {offsets = [0, 8], sizes = [2, 8], strides = [1, 1]} : vector<2x24xf32> to vector<2x8xf32>
    %21 = vector.extract_strided_slice %16 {offsets = [0, 16], sizes = [2, 8], strides = [1, 1]} : vector<2x24xf32> to vector<2x8xf32>
    %22 = arith.mulf %20, %8 : vector<2x8xf32>
    %23 = arith.mulf %19, %18 : vector<2x8xf32>
    %24 = arith.addf %22, %23 : vector<2x8xf32>
    %25 = math.tanh %24 : vector<2x8xf32>
    %26 = arith.mulf %21, %25 : vector<2x8xf32>
    %cst_11 = arith.constant dense<0.000000e+00> : vector<2x32xf32>
    %27 = tpu.matmul %26, %6, %cst_11 {dimension_numbers = #tpu.dot_dimension_numbers<[1], [0], [0], [1], [0, 0, 1, 1], [], []>} : vector<2x8xf32>, vector<8x32xf32>, vector<2x32xf32> -> vector<2x32xf32>
    %28 = arith.addf %5, %27 : vector<2x32xf32>
    %29 = vector.extract_strided_slice %28 {offsets = [0, 0], sizes = [2, 24], strides = [1, 1]} : vector<2x32xf32> to vector<2x24xf32>
    %30 = arith.negf %29 : vector<2x24xf32>
    %31 = math.exp %30 : vector<2x24xf32>
    %cst_12 = arith.constant 1.000000e+00 : f32
    %32 = vector.broadcast %cst_12 : f32 to vector<2x24xf32>
    %33 = arith.addf %32, %31 : vector<2x24xf32>
    %34 = arith.divf %32, %33 : vector<2x24xf32>
    %35 = vector.extract_strided_slice %28 {offsets = [0, 24], sizes = [2, 8], strides = [1, 1]} : vector<2x32xf32> to vector<2x8xf32>
    %36 = math.tanh %35 : vector<2x8xf32>
    %37 = vector.extract_strided_slice %34 {offsets = [0, 0], sizes = [2, 8], strides = [1, 1]} : vector<2x24xf32> to vector<2x8xf32>
    %38 = vector.extract_strided_slice %34 {offsets = [0, 8], sizes = [2, 8], strides = [1, 1]} : vector<2x24xf32> to vector<2x8xf32>
    %39 = vector.extract_strided_slice %34 {offsets = [0, 16], sizes = [2, 8], strides = [1, 1]} : vector<2x24xf32> to vector<2x8xf32>
    %40 = arith.mulf %38, %24 : vector<2x8xf32>
    %41 = arith.mulf %37, %36 : vector<2x8xf32>
    %42 = arith.addf %40, %41 : vector<2x8xf32>
    %43 = math.tanh %42 : vector<2x8xf32>
    %44 = arith.mulf %39, %43 : vector<2x8xf32>
    %cst_13 = arith.constant dense<0.000000e+00> : vector<2x32xf32>
    %45 = tpu.matmul %44, %6, %cst_13 {dimension_numbers = #tpu.dot_dimension_numbers<[1], [0], [0], [1], [0, 0, 1, 1], [], []>} : vector<2x8xf32>, vector<8x32xf32>, vector<2x32xf32> -> vector<2x32xf32>
    %46 = arith.addf %5, %45 : vector<2x32xf32>
    %47 = vector.extract_strided_slice %46 {offsets = [0, 0], sizes = [2, 24], strides = [1, 1]} : vector<2x32xf32> to vector<2x24xf32>
    %48 = arith.negf %47 : vector<2x24xf32>
    %49 = math.exp %48 : vector<2x24xf32>
    %cst_14 = arith.constant 1.000000e+00 : f32
    %50 = vector.broadcast %cst_14 : f32 to vector<2x24xf32>
    %51 = arith.addf %50, %49 : vector<2x24xf32>
    %52 = arith.divf %50, %51 : vector<2x24xf32>
    %53 = vector.extract_strided_slice %46 {offsets = [0, 24], sizes = [2, 8], strides = [1, 1]} : vector<2x32xf32> to vector<2x8xf32>
    %54 = math.tanh %53 : vector<2x8xf32>
    %55 = vector.extract_strided_slice %52 {offsets = [0, 0], sizes = [2, 8], strides = [1, 1]} : vector<2x24xf32> to vector<2x8xf32>
    %56 = vector.extract_strided_slice %52 {offsets = [0, 8], sizes = [2, 8], strides = [1, 1]} : vector<2x24xf32> to vector<2x8xf32>
    %57 = vector.extract_strided_slice %52 {offsets = [0, 16], sizes = [2, 8], strides = [1, 1]} : vector<2x24xf32> to vector<2x8xf32>
    %58 = arith.mulf %56, %42 : vector<2x8xf32>
    %59 = arith.mulf %55, %54 : vector<2x8xf32>
    %60 = arith.addf %58, %59 : vector<2x8xf32>
    %61 = math.tanh %60 : vector<2x8xf32>
    %62 = arith.mulf %57, %61 : vector<2x8xf32>
    %cst_15 = arith.constant dense<0.000000e+00> : vector<2x32xf32>
    %63 = tpu.matmul %62, %6, %cst_15 {dimension_numbers = #tpu.dot_dimension_numbers<[1], [0], [0], [1], [0, 0, 1, 1], [], []>} : vector<2x8xf32>, vector<8x32xf32>, vector<2x32xf32> -> vector<2x32xf32>
    %64 = arith.addf %5, %63 : vector<2x32xf32>
    %65 = vector.extract_strided_slice %64 {offsets = [0, 0], sizes = [2, 24], strides = [1, 1]} : vector<2x32xf32> to vector<2x24xf32>
    %66 = arith.negf %65 : vector<2x24xf32>
    %67 = math.exp %66 : vector<2x24xf32>
    %cst_16 = arith.constant 1.000000e+00 : f32
    %68 = vector.broadcast %cst_16 : f32 to vector<2x24xf32>
    %69 = arith.addf %68, %67 : vector<2x24xf32>
    %70 = arith.divf %68, %69 : vector<2x24xf32>
    %71 = vector.extract_strided_slice %64 {offsets = [0, 24], sizes = [2, 8], strides = [1, 1]} : vector<2x32xf32> to vector<2x8xf32>
    %72 = math.tanh %71 : vector<2x8xf32>
    %73 = vector.extract_strided_slice %70 {offsets = [0, 0], sizes = [2, 8], strides = [1, 1]} : vector<2x24xf32> to vector<2x8xf32>
    %74 = vector.extract_strided_slice %70 {offsets = [0, 8], sizes = [2, 8], strides = [1, 1]} : vector<2x24xf32> to vector<2x8xf32>
    %75 = vector.extract_strided_slice %70 {offsets = [0, 16], sizes = [2, 8], strides = [1, 1]} : vector<2x24xf32> to vector<2x8xf32>
    %76 = arith.mulf %74, %60 : vector<2x8xf32>
    %77 = arith.mulf %73, %72 : vector<2x8xf32>
    %78 = arith.addf %76, %77 : vector<2x8xf32>
    %79 = math.tanh %78 : vector<2x8xf32>
    %80 = arith.mulf %75, %79 : vector<2x8xf32>
    %cst_17 = arith.constant dense<0.000000e+00> : vector<2x32xf32>
    %81 = tpu.matmul %80, %6, %cst_17 {dimension_numbers = #tpu.dot_dimension_numbers<[1], [0], [0], [1], [0, 0, 1, 1], [], []>} : vector<2x8xf32>, vector<8x32xf32>, vector<2x32xf32> -> vector<2x32xf32>
    %82 = arith.addf %5, %81 : vector<2x32xf32>
    %83 = vector.extract_strided_slice %82 {offsets = [0, 0], sizes = [2, 24], strides = [1, 1]} : vector<2x32xf32> to vector<2x24xf32>
    %84 = arith.negf %83 : vector<2x24xf32>
    %85 = math.exp %84 : vector<2x24xf32>
    %cst_18 = arith.constant 1.000000e+00 : f32
    %86 = vector.broadcast %cst_18 : f32 to vector<2x24xf32>
    %87 = arith.addf %86, %85 : vector<2x24xf32>
    %88 = arith.divf %86, %87 : vector<2x24xf32>
    %89 = vector.extract_strided_slice %82 {offsets = [0, 24], sizes = [2, 8], strides = [1, 1]} : vector<2x32xf32> to vector<2x8xf32>
    %90 = math.tanh %89 : vector<2x8xf32>
    %91 = vector.extract_strided_slice %88 {offsets = [0, 0], sizes = [2, 8], strides = [1, 1]} : vector<2x24xf32> to vector<2x8xf32>
    %92 = vector.extract_strided_slice %88 {offsets = [0, 8], sizes = [2, 8], strides = [1, 1]} : vector<2x24xf32> to vector<2x8xf32>
    %93 = vector.extract_strided_slice %88 {offsets = [0, 16], sizes = [2, 8], strides = [1, 1]} : vector<2x24xf32> to vector<2x8xf32>
    %94 = arith.mulf %92, %78 : vector<2x8xf32>
    %95 = arith.mulf %91, %90 : vector<2x8xf32>
    %96 = arith.addf %94, %95 : vector<2x8xf32>
    %97 = math.tanh %96 : vector<2x8xf32>
    %98 = arith.mulf %93, %97 : vector<2x8xf32>
    %cst_19 = arith.constant dense<0.000000e+00> : vector<2x32xf32>
    %99 = tpu.matmul %98, %6, %cst_19 {dimension_numbers = #tpu.dot_dimension_numbers<[1], [0], [0], [1], [0, 0, 1, 1], [], []>} : vector<2x8xf32>, vector<8x32xf32>, vector<2x32xf32> -> vector<2x32xf32>
    %100 = arith.addf %5, %99 : vector<2x32xf32>
    %101 = vector.extract_strided_slice %100 {offsets = [0, 0], sizes = [2, 24], strides = [1, 1]} : vector<2x32xf32> to vector<2x24xf32>
    %102 = arith.negf %101 : vector<2x24xf32>
    %103 = math.exp %102 : vector<2x24xf32>
    %cst_20 = arith.constant 1.000000e+00 : f32
    %104 = vector.broadcast %cst_20 : f32 to vector<2x24xf32>
    %105 = arith.addf %104, %103 : vector<2x24xf32>
    %106 = arith.divf %104, %105 : vector<2x24xf32>
    %107 = vector.extract_strided_slice %100 {offsets = [0, 24], sizes = [2, 8], strides = [1, 1]} : vector<2x32xf32> to vector<2x8xf32>
    %108 = math.tanh %107 : vector<2x8xf32>
    %109 = vector.extract_strided_slice %106 {offsets = [0, 0], sizes = [2, 8], strides = [1, 1]} : vector<2x24xf32> to vector<2x8xf32>
    %110 = vector.extract_strided_slice %106 {offsets = [0, 8], sizes = [2, 8], strides = [1, 1]} : vector<2x24xf32> to vector<2x8xf32>
    %111 = vector.extract_strided_slice %106 {offsets = [0, 16], sizes = [2, 8], strides = [1, 1]} : vector<2x24xf32> to vector<2x8xf32>
    %112 = arith.mulf %110, %96 : vector<2x8xf32>
    %113 = arith.mulf %109, %108 : vector<2x8xf32>
    %114 = arith.addf %112, %113 : vector<2x8xf32>
    %115 = math.tanh %114 : vector<2x8xf32>
    %116 = arith.mulf %111, %115 : vector<2x8xf32>
    %cst_21 = arith.constant dense<0.000000e+00> : vector<2x32xf32>
    %117 = tpu.matmul %116, %6, %cst_21 {dimension_numbers = #tpu.dot_dimension_numbers<[1], [0], [0], [1], [0, 0, 1, 1], [], []>} : vector<2x8xf32>, vector<8x32xf32>, vector<2x32xf32> -> vector<2x32xf32>
    %118 = arith.addf %5, %117 : vector<2x32xf32>
    %119 = vector.extract_strided_slice %118 {offsets = [0, 0], sizes = [2, 24], strides = [1, 1]} : vector<2x32xf32> to vector<2x24xf32>
    %120 = arith.negf %119 : vector<2x24xf32>
    %121 = math.exp %120 : vector<2x24xf32>
    %cst_22 = arith.constant 1.000000e+00 : f32
    %122 = vector.broadcast %cst_22 : f32 to vector<2x24xf32>
    %123 = arith.addf %122, %121 : vector<2x24xf32>
    %124 = arith.divf %122, %123 : vector<2x24xf32>
    %125 = vector.extract_strided_slice %118 {offsets = [0, 24], sizes = [2, 8], strides = [1, 1]} : vector<2x32xf32> to vector<2x8xf32>
    %126 = math.tanh %125 : vector<2x8xf32>
    %127 = vector.extract_strided_slice %124 {offsets = [0, 0], sizes = [2, 8], strides = [1, 1]} : vector<2x24xf32> to vector<2x8xf32>
    %128 = vector.extract_strided_slice %124 {offsets = [0, 8], sizes = [2, 8], strides = [1, 1]} : vector<2x24xf32> to vector<2x8xf32>
    %129 = vector.extract_strided_slice %124 {offsets = [0, 16], sizes = [2, 8], strides = [1, 1]} : vector<2x24xf32> to vector<2x8xf32>
    %130 = arith.mulf %128, %114 : vector<2x8xf32>
    %131 = arith.mulf %127, %126 : vector<2x8xf32>
    %132 = arith.addf %130, %131 : vector<2x8xf32>
    %133 = math.tanh %132 : vector<2x8xf32>
    %134 = arith.mulf %129, %133 : vector<2x8xf32>
    %cst_23 = arith.constant dense<0.000000e+00> : vector<2x32xf32>
    %135 = tpu.matmul %134, %6, %cst_23 {dimension_numbers = #tpu.dot_dimension_numbers<[1], [0], [0], [1], [0, 0, 1, 1], [], []>} : vector<2x8xf32>, vector<8x32xf32>, vector<2x32xf32> -> vector<2x32xf32>
    %136 = arith.addf %5, %135 : vector<2x32xf32>
    %137 = vector.extract_strided_slice %136 {offsets = [0, 0], sizes = [2, 24], strides = [1, 1]} : vector<2x32xf32> to vector<2x24xf32>
    %138 = arith.negf %137 : vector<2x24xf32>
    %139 = math.exp %138 : vector<2x24xf32>
    %cst_24 = arith.constant 1.000000e+00 : f32
    %140 = vector.broadcast %cst_24 : f32 to vector<2x24xf32>
    %141 = arith.addf %140, %139 : vector<2x24xf32>
    %142 = arith.divf %140, %141 : vector<2x24xf32>
    %143 = vector.extract_strided_slice %136 {offsets = [0, 24], sizes = [2, 8], strides = [1, 1]} : vector<2x32xf32> to vector<2x8xf32>
    %144 = math.tanh %143 : vector<2x8xf32>
    %145 = vector.extract_strided_slice %142 {offsets = [0, 0], sizes = [2, 8], strides = [1, 1]} : vector<2x24xf32> to vector<2x8xf32>
    %146 = vector.extract_strided_slice %142 {offsets = [0, 8], sizes = [2, 8], strides = [1, 1]} : vector<2x24xf32> to vector<2x8xf32>
    %147 = vector.extract_strided_slice %142 {offsets = [0, 16], sizes = [2, 8], strides = [1, 1]} : vector<2x24xf32> to vector<2x8xf32>
    %148 = arith.mulf %146, %132 : vector<2x8xf32>
    %149 = arith.mulf %145, %144 : vector<2x8xf32>
    %150 = arith.addf %148, %149 : vector<2x8xf32>
    %151 = math.tanh %150 : vector<2x8xf32>
    %152 = arith.mulf %147, %151 : vector<2x8xf32>
    %153 = vector.shape_cast %26 : vector<2x8xf32> to vector<2x1x8xf32>
    %154 = vector.shape_cast %44 : vector<2x8xf32> to vector<2x1x8xf32>
    %155 = vector.shape_cast %62 : vector<2x8xf32> to vector<2x1x8xf32>
    %156 = vector.shape_cast %80 : vector<2x8xf32> to vector<2x1x8xf32>
    %157 = vector.shape_cast %98 : vector<2x8xf32> to vector<2x1x8xf32>
    %158 = vector.shape_cast %116 : vector<2x8xf32> to vector<2x1x8xf32>
    %159 = vector.shape_cast %134 : vector<2x8xf32> to vector<2x1x8xf32>
    %160 = vector.shape_cast %152 : vector<2x8xf32> to vector<2x1x8xf32>
    %161 = tpu.concatenate %153, %154, %155, %156, %157, %158, %159, %160 in 1 : vector<2x1x8xf32>, vector<2x1x8xf32>, vector<2x1x8xf32>, vector<2x1x8xf32>, vector<2x1x8xf32>, vector<2x1x8xf32>, vector<2x1x8xf32>, vector<2x1x8xf32> -> vector<2x8x8xf32>
    %162 = vector.shape_cast %161 : vector<2x8x8xf32> to vector<16x8xf32>
    %c0_25 = arith.constant 0 : index
    %c0_26 = arith.constant 0 : index
    %163 = vector.load %arg4[%c0_25, %c0_26] : memref<8x4xf32, #tpu.memory_space<vmem>>, vector<8x4xf32>
    %cst_27 = arith.constant dense<0.000000e+00> : vector<16x4xf32>
    %164 = tpu.matmul %162, %163, %cst_27 {dimension_numbers = #tpu.dot_dimension_numbers<[1], [0], [0], [1], [0, 0, 1, 1], [], []>} : vector<16x8xf32>, vector<8x4xf32>, vector<16x4xf32> -> vector<16x4xf32>
    %c0_28 = arith.constant 0 : index
    %c0_29 = arith.constant 0 : index
    %165 = vector.load %arg5[%c0_28, %c0_29] : memref<1x4xf32, #tpu.memory_space<vmem>>, vector<1x4xf32>
    %166 = vector.broadcast %165 : vector<1x4xf32> to vector<16x4xf32>
    %167 = arith.addf %164, %166 : vector<16x4xf32>
    %c0_30 = arith.constant 0 : index
    %c0_31 = arith.constant 0 : index
    %168 = vector.load %arg6[%c0_30, %c0_31] : memref<16x4xf32, #tpu.memory_space<vmem>>, vector<16x4xf32>
    tpu.vector_store %arg6[%c0_30, %c0_31], %167 {strides = array<i32>} : memref<16x4xf32, #tpu.memory_space<vmem>>, vector<16x4xf32>,
    return
  }
}

</mosaic_0001>

<bundles_post_ra>
// kernel: tpu_custom_call.1
= control target key start
LH: loop header
LB: loop body
LE: loop exit
PB: predicated region body
PF: predicated region fallthrough
CT: control target
= control target key end

     0   :  { %vm36_vm0 = vcmask 1043456   ;;  %v1440_v0 = vmov 0.0   ;;  %vm32_vm1 = vcmask 31744   ;;  %vm1441_vm2 = vmmov 0   ;;  %s1444_s27 = smov 112   ;;  %s1643_s1 = inlined_call_operand.vmem [shape: f32[4,32], index: 1, kind: input, shape index: {}]   ;;  %s1644_s2 = inlined_call_operand.vmem [shape: f32[8,32], index: 2, kind: input, shape index: {}]   ;;  %s1645_s0 = inlined_call_operand.vmem [shape: f32[2,4], index: 0, kind: input, shape index: {}]   ;;  %s1646_s3 = inlined_call_operand.vmem [shape: f32[1,32], index: 3, kind: input, shape index: {}]   ;;  %s1647_s4 = inlined_call_operand.vmem [shape: f32[8,4], index: 4, kind: input, shape index: {}]   ;;  %s1648_s5 = inlined_call_operand.vmem [shape: f32[1,4], index: 5, kind: input, shape index: {}]   ;;  %s1649_s6 = inlined_call_operand.vmem [shape: f32[16,4], index: 6, kind: output, shape index: {}]  }
   0x1   :  { %1320 = vmatprep.subr.mxu0 %v1440_v0  ;;  %1325 = vmatprep.subr.mxu1 %v1440_v0  ;;  %v24_v1 = vld [vmem:[%s1643_s1] sm:$0xf]  ;;  %vm111_vm3 = vcmask 64512   ;;  %v1445_v39 = vmov 1966171168   ;;  %v913_v41 = vlaneseq  ;;  %vm1159_vm4 = vcmask 1040384  }
   0x2   :  { %v1489_v2 = vld [vmem:[%s1644_s2] sm:$0xff]  ;;  %1321 = vmatpush3.msk.msra.mxu0 %vm36_vm0, %v24_v1  ;;  %1322 = vmatprep.mubr.msk.f32.mxu0 %vm1441_vm2, %v1440_v0  ;;  %s1442_s2 = smov 104   ;;  %v911_v40 = vunpack.c.l.s4 %v1445_v39  ;;  %vm1162_vm5 = vcmask 1041408   ;;  %vm1165_vm6 = vcmask 1042432   ;;  %vm1170_vm7 = vcmask 1044480  }
   0x3   :  { %v23_v3 = vld [vmem:[%s1645_s0] sm:$0x3]  ;;  %1326 = vmatpush3.msra.mxu1 %v1489_v2  ;;  %1327 = vmatprep.mubr.msk.f32.mxu1 %vm1441_vm2, %v1440_v0  ;;  %v914_v43 = vshrl.u32 %v913_v41, 7  ;;  %vm1173_vm8 = vcmask 1045504   ;;  %vm1176_vm9 = vcmask 1046528  }
   0x4   :  { %1323 = vmatmul.mubr.msk.f32.vlgmr.msra.gmra.mxu0 %vm32_vm1, %v23_v3  ;;  %1328 = vmatmul.mubr.f32.vlgmr.msra.gmra.mxu1 %v1440_v0  ;;  %v1278_v4 = vld [vmem:[%s1646_s3] ss:$0 sm:$0xff]  ;;  %s1443_s3 = smov 8   ;;  %v912_v42 = vunpack.c.0.s8 %v911_v40 }
   0x5   :  { %1330 = vmatprep.subr.mxu0 %v1440_v0  ;;  %1332 = vmatprep.mubr.msk.f32.mxu0 %vm1441_vm2, %v1440_v0  ;;  %v1534_v48 = vsub.s32 0, %v914_v43 }
   0x6   :  { %1331 = vmatpush3.msra.mxu0 %v1489_v2  ;;  %1335 = vmatprep.subr.mxu1 %v1440_v0  ;;  %v1531_v44 = vsub.s32 %v912_v42, %v914_v43 }
   0x7   :  { %1336 = vmatpush3.msra.mxu1 %v1489_v2  ;;  %1337 = vmatprep.mubr.msk.f32.mxu1 %vm1441_vm2, %v1440_v0 }
   0x8   :  { %1340 = vmatprep.subr.mxu0 %v1440_v0  ;;  %1345 = vmatprep.subr.mxu1 %v1440_v0 }
  0xc4   :  { %v106_v5 = vpop.f32.mrf.mxu0  ;;  %v181_v6 = vpop.f32.mrf.mxu1 }
  0xc5   :  { %v1515_v7 = vadd.f32 %v1278_v4, %v106_v5 }
  0xc6   :  { %v1324_v8 = vpop.f32.mrf.mxu0  ;;  %v1329_v9 = vpop.f32.mrf.mxu1 }
  0xc7   :  { %v185_v10 = vadd.f32 %v181_v6, %v1515_v7 }
  0xc9   :  { %1376 = vtanh.f32 %v185_v10  ;;  %v1281_v12 = vmul.f32 -1.442695, %v185_v10 }
  0xcb   :  { %1378 = vpow2.f32 %v1281_v12 }
  0xd6   :  { %v1377_v11 = vpop.eup %1376 }
  0xd7   :  { %195 = vrot.lane.b32.xlu0 %v1377_v11, %s1442_s2 }
  0xd8   :  { %v1379_v13 = vpop.eup %1378 }
  0xd9   :  { %v189_v14 = vadd.f32 1.0, %v1379_v13 }
  0xdb   :  { %1380 = vrcp.f32 %v189_v14 }
  0xe8   :  { %v1381_v15 = vpop.eup %1380 }
  0xe9   :  { %v193_v18 = vmul.f32 0.0, %v1381_v15 }
 0x149   :  { %v196_v16 = vpop.permute.xlu0 %195 }
 0x14a   :  { %v198_v17 = vmul.f32 %v1381_v15, %v196_v16 }
 0x14c   :  { %200 = vrot.lane.b32.xlu0 %v198_v17, %s1443_s3 }
 0x1be   :  { %v201_v19 = vpop.permute.xlu0 %200 }
 0x1bf   :  { %v203_v20 = vadd.f32 %v201_v19, %v193_v18 }
 0x1c1   :  { %1382 = vtanh.f32 %v203_v20 }
 0x1ce   :  { %v1383_v21 = vpop.eup %1382 }
 0x1cf   :  { %206 = vrot.lane.b32.xlu1 %v1383_v21, %s1443_s3 }
 0x241   :  { %v207_v22 = vpop.permute.xlu1 %206 }
 0x242   :  { %v209_v23 = vmul.f32 %v1381_v15, %v207_v22 }
 0x244   :  { %211 = vrot.lane.b32.xlu1 %v209_v23, %s1444_s27  ;;  %v916_v46 = vrot.slane %v209_v23, %v1531_v44 }
 0x246   :  { %v917_v50 = vcombine.high %v916_v46, %v916_v46  ;;  %v924_v53 = vrot.slane %v916_v46, %v1531_v44 }
 0x248   :  { %v931_v56 = vrot.slane %v917_v50, %v1531_v44 }
 0x2b6   :  { %v212_v24 = vpop.permute.xlu1 %211 }
 0x2b7   :  { %1333 = vmatmul.mubr.msk.f32.vlgmr.msra.gmra.mxu0 %vm111_vm3, %v212_v24 }
 0x2b8   :  { %1341 = vmatpush3.msra.mxu0 %v1489_v2  ;;  %1342 = vmatprep.mubr.msk.f32.mxu0 %vm1441_vm2, %v1440_v0 }
 0x2b9   :  { %1350 = vmatprep.subr.mxu0 %v1440_v0 }
 0x377   :  { %v281_v25 = vpop.f32.mrf.mxu0 }
 0x378   :  { %v285_v26 = vadd.f32 %v281_v25, %v1515_v7 }
 0x379   :  { %v1334_v27 = vpop.f32.mrf.mxu0 }
 0x37a   :  { %1384 = vtanh.f32 %v285_v26  ;;  %v1283_v29 = vmul.f32 -1.442695, %v285_v26 }
 0x37c   :  { %1386 = vpow2.f32 %v1283_v29 }
 0x387   :  { %v1385_v28 = vpop.eup %1384 }
 0x388   :  { %295 = vrot.lane.b32.xlu0 %v1385_v28, %s1442_s2 }
 0x389   :  { %v1387_v30 = vpop.eup %1386 }
 0x38a   :  { %v289_v31 = vadd.f32 1.0, %v1387_v30 }
 0x38c   :  { %1388 = vrcp.f32 %v289_v31 }
 0x399   :  { %v1389_v32 = vpop.eup %1388 }
 0x39a   :  { %v293_v35 = vmul.f32 %v1389_v32, %v203_v20 }
 0x3fa   :  { %v296_v33 = vpop.permute.xlu0 %295 }
 0x3fb   :  { %v298_v34 = vmul.f32 %v1389_v32, %v296_v33 }
 0x3fd   :  { %300 = vrot.lane.b32.xlu1 %v298_v34, %s1443_s3 }
 0x46f   :  { %v301_v36 = vpop.permute.xlu1 %300 }
 0x470   :  { %v303_v37 = vadd.f32 %v301_v36, %v293_v35 }
 0x472   :  { %1390 = vtanh.f32 %v303_v37 }
 0x47f   :  { %v1391_v38 = vpop.eup %1390 }
 0x480   :  { %306 = vrot.lane.b32.xlu0 %v1391_v38, %s1443_s3 }
 0x4f2   :  { %v307_v45 = vpop.permute.xlu0 %306 }
 0x4f3   :  { %v309_v47 = vmul.f32 %v1389_v32, %v307_v45 }
 0x4f5   :  { %v940_v49 = vrot.slane %v309_v47, %v1531_v44  ;;  %311 = vrot.lane.b32.xlu1 %v309_v47, %s1444_s27 }
 0x4f7   :  { %v941_v51 = vcombine.high %v940_v49, %v940_v49  ;;  %v948_v52 = vrot.slane %v940_v49, %v1531_v44 }
 0x4f9   :  { %v955_v54 = vrot.slane %v941_v51, %v1531_v44  ;;  %v1092_v55 = vrot.slane %v948_v52, %v1534_v48 }
 0x4fb   :  { %v1096_v57 = vrot.slane %v955_v54, %v1534_v48  ;;  %v1160_v58 = vsel %vm1159_vm4, %v924_v53, %v1092_v55 }
 0x4fd   :  { %v1161_v59 = vsel %vm1159_vm4, %v931_v56, %v1096_v57 }
 0x567   :  { %v312_v60 = vpop.permute.xlu1 %311 }
 0x568   :  { %1338 = vmatmul.mubr.msk.f32.vlgmr.msra.gmra.mxu1 %vm111_vm3, %v312_v60 }
 0x569   :  { %1346 = vmatpush3.msra.mxu1 %v1489_v2  ;;  %1347 = vmatprep.mubr.msk.f32.mxu1 %vm1441_vm2, %v1440_v0 }
 0x56a   :  { %1355 = vmatprep.subr.mxu1 %v1440_v0 }
 0x628   :  { %v381_v61 = vpop.f32.mrf.mxu1 }
 0x629   :  { %v385_v62 = vadd.f32 %v381_v61, %v1515_v7 }
 0x62a   :  { %v1339_v63 = vpop.f32.mrf.mxu1 }
 0x62b   :  { %1392 = vtanh.f32 %v385_v62  ;;  %v1285_v3 = vmul.f32 -1.442695, %v385_v62 }
 0x62d   :  { %1394 = vpow2.f32 %v1285_v3 }
 0x638   :  { %v1393_v1 = vpop.eup %1392 }
 0x639   :  { %395 = vrot.lane.b32.xlu0 %v1393_v1, %s1442_s2 }
 0x63a   :  { %v1395_v4 = vpop.eup %1394 }
 0x63b   :  { %v389_v5 = vadd.f32 1.0, %v1395_v4 }
 0x63d   :  { %1396 = vrcp.f32 %v389_v5 }
 0x64a   :  { %v1397_v6 = vpop.eup %1396 }
 0x64b   :  { %v393_v10 = vmul.f32 %v1397_v6, %v303_v37 }
 0x6ab   :  { %v396_v8 = vpop.permute.xlu0 %395 }
 0x6ac   :  { %v398_v9 = vmul.f32 %v1397_v6, %v396_v8 }
 0x6ae   :  { %400 = vrot.lane.b32.xlu1 %v398_v9, %s1443_s3 }
 0x720   :  { %v401_v11 = vpop.permute.xlu1 %400 }
 0x721   :  { %v403_v12 = vadd.f32 %v401_v11, %v393_v10 }
 0x723   :  { %1398 = vtanh.f32 %v403_v12 }
 0x730   :  { %v1399_v13 = vpop.eup %1398 }
 0x731   :  { %406 = vrot.lane.b32.xlu0 %v1399_v13, %s1443_s3 }
 0x7a3   :  { %v407_v14 = vpop.permute.xlu0 %406 }
 0x7a4   :  { %v409_v15 = vmul.f32 %v1397_v6, %v407_v14 }
 0x7a6   :  { %v962_v16 = vrot.slane %v409_v15, %v1531_v44  ;;  %411 = vrot.lane.b32.xlu1 %v409_v15, %s1444_s27 }
 0x7a8   :  { %v963_v17 = vcombine.high %v962_v16, %v962_v16  ;;  %v970_v18 = vrot.slane %v962_v16, %v1531_v44 }
 0x7aa   :  { %v977_v19 = vrot.slane %v963_v17, %v1531_v44  ;;  %v1102_v20 = vrot.slane %v970_v18, %v1534_v48 }
 0x7ac   :  { %v1106_v21 = vrot.slane %v977_v19, %v1534_v48  ;;  %v1163_v22 = vsel %vm1162_vm5, %v1160_v58, %v1102_v20 }
 0x7ae   :  { %v1164_v23 = vsel %vm1162_vm5, %v1161_v59, %v1106_v21 }
 0x818   :  { %v412_v24 = vpop.permute.xlu1 %411 }
 0x819   :  { %1343 = vmatmul.mubr.msk.f32.vlgmr.msra.gmra.mxu0 %vm111_vm3, %v412_v24 }
 0x81a   :  { %1351 = vmatpush3.msra.mxu0 %v1489_v2  ;;  %1352 = vmatprep.mubr.msk.f32.mxu0 %vm1441_vm2, %v1440_v0 }
 0x81b   :  { %1360 = vmatprep.subr.mxu0 %v1440_v0 }
 0x8d9   :  { %v481_v25 = vpop.f32.mrf.mxu0 }
 0x8da   :  { %v485_v26 = vadd.f32 %v481_v25, %v1515_v7 }
 0x8db   :  { %v1344_v27 = vpop.f32.mrf.mxu0 }
 0x8dc   :  { %1400 = vtanh.f32 %v485_v26  ;;  %v1287_v29 = vmul.f32 -1.442695, %v485_v26 }
 0x8de   :  { %1402 = vpow2.f32 %v1287_v29 }
 0x8e9   :  { %v1401_v28 = vpop.eup %1400 }
 0x8ea   :  { %495 = vrot.lane.b32.xlu0 %v1401_v28, %s1442_s2 }
 0x8eb   :  { %v1403_v30 = vpop.eup %1402 }
 0x8ec   :  { %v489_v31 = vadd.f32 1.0, %v1403_v30 }
 0x8ee   :  { %1404 = vrcp.f32 %v489_v31 }
 0x8fb   :  { %v1405_v32 = vpop.eup %1404 }
 0x8fc   :  { %v493_v35 = vmul.f32 %v1405_v32, %v403_v12 }
 0x95c   :  { %v496_v33 = vpop.permute.xlu0 %495 }
 0x95d   :  { %v498_v34 = vmul.f32 %v1405_v32, %v496_v33 }
 0x95f   :  { %500 = vrot.lane.b32.xlu1 %v498_v34, %s1443_s3 }
 0x9d1   :  { %v501_v36 = vpop.permute.xlu1 %500 }
 0x9d2   :  { %v503_v37 = vadd.f32 %v501_v36, %v493_v35 }
 0x9d4   :  { %1406 = vtanh.f32 %v503_v37 }
 0x9e1   :  { %v1407_v38 = vpop.eup %1406 }
 0x9e2   :  { %506 = vrot.lane.b32.xlu0 %v1407_v38, %s1443_s3 }
 0xa54   :  { %v507_v39 = vpop.permute.xlu0 %506 }
 0xa55   :  { %v509_v40 = vmul.f32 %v1405_v32, %v507_v39 }
 0xa57   :  { %v984_v41 = vrot.slane %v509_v40, %v1531_v44  ;;  %511 = vrot.lane.b32.xlu1 %v509_v40, %s1444_s27 }
 0xa59   :  { %v985_v42 = vcombine.high %v984_v41, %v984_v41  ;;  %v992_v43 = vrot.slane %v984_v41, %v1531_v44 }
 0xa5b   :  { %v999_v45 = vrot.slane %v985_v42, %v1531_v44  ;;  %v1112_v46 = vrot.slane %v992_v43, %v1534_v48 }
 0xa5d   :  { %v1116_v47 = vrot.slane %v999_v45, %v1534_v48  ;;  %v1166_v49 = vsel %vm1165_vm6, %v1163_v22, %v1112_v46 }
 0xa5f   :  { %v1167_v50 = vsel %vm1165_vm6, %v1164_v23, %v1116_v47 }
 0xac9   :  { %v512_v51 = vpop.permute.xlu1 %511 }
 0xaca   :  { %1348 = vmatmul.mubr.msk.f32.vlgmr.msra.gmra.mxu1 %vm111_vm3, %v512_v51 }
 0xacb   :  { %1356 = vmatpush3.msra.mxu1 %v1489_v2  ;;  %1357 = vmatprep.mubr.msk.f32.mxu1 %vm1441_vm2, %v1440_v0 }
 0xb8a   :  { %v581_v52 = vpop.f32.mrf.mxu1 }
 0xb8b   :  { %v585_v53 = vadd.f32 %v581_v52, %v1515_v7 }
 0xb8c   :  { %v1349_v54 = vpop.f32.mrf.mxu1 }
 0xb8d   :  { %1408 = vtanh.f32 %v585_v53  ;;  %v1289_v56 = vmul.f32 -1.442695, %v585_v53 }
 0xb8f   :  { %1410 = vpow2.f32 %v1289_v56 }
 0xb9a   :  { %v1409_v55 = vpop.eup %1408 }
 0xb9b   :  { %595 = vrot.lane.b32.xlu0 %v1409_v55, %s1442_s2 }
 0xb9c   :  { %v1411_v57 = vpop.eup %1410 }
 0xb9d   :  { %v589_v58 = vadd.f32 1.0, %v1411_v57 }
 0xb9f   :  { %1412 = vrcp.f32 %v589_v58 }
 0xbac   :  { %v1413_v59 = vpop.eup %1412 }
 0xbad   :  { %v593_v62 = vmul.f32 %v1413_v59, %v503_v37 }
 0xc0d   :  { %v596_v60 = vpop.permute.xlu0 %595 }
 0xc0e   :  { %v598_v61 = vmul.f32 %v1413_v59, %v596_v60 }
 0xc10   :  { %600 = vrot.lane.b32.xlu1 %v598_v61, %s1443_s3 }
 0xc82   :  { %v601_v63 = vpop.permute.xlu1 %600 }
 0xc83   :  { %v603_v1 = vadd.f32 %v601_v63, %v593_v62 }
 0xc85   :  { %1414 = vtanh.f32 %v603_v1 }
 0xc92   :  { %v1415_v3 = vpop.eup %1414 }
 0xc93   :  { %606 = vrot.lane.b32.xlu0 %v1415_v3, %s1443_s3 }
 0xd05   :  { %v607_v4 = vpop.permute.xlu0 %606 }
 0xd06   :  { %v609_v5 = vmul.f32 %v1413_v59, %v607_v4 }
 0xd08   :  { %v1006_v6 = vrot.slane %v609_v5, %v1531_v44  ;;  %611 = vrot.lane.b32.xlu1 %v609_v5, %s1444_s27 }
 0xd0a   :  { %v1007_v8 = vcombine.high %v1006_v6, %v1006_v6  ;;  %v1014_v9 = vrot.slane %v1006_v6, %v1531_v44 }
 0xd0c   :  { %v1021_v10 = vrot.slane %v1007_v8, %v1531_v44  ;;  %v1122_v11 = vrot.slane %v1014_v9, %v1534_v48 }
 0xd0e   :  { %v1126_v12 = vrot.slane %v1021_v10, %v1534_v48  ;;  %v1168_v13 = vsel %vm36_vm0, %v1166_v49, %v1122_v11 }
 0xd10   :  { %v1169_v14 = vsel %vm36_vm0, %v1167_v50, %v1126_v12 }
 0xd7a   :  { %v612_v15 = vpop.permute.xlu1 %611 }
 0xd7b   :  { %1353 = vmatmul.mubr.msk.f32.vlgmr.msra.gmra.mxu0 %vm111_vm3, %v612_v15 }
 0xd7c   :  { %1361 = vmatpush3.msra.mxu0 %v1489_v2  ;;  %1362 = vmatprep.mubr.msk.f32.mxu0 %vm1441_vm2, %v1440_v0 }
 0xe3b   :  { %v681_v16 = vpop.f32.mrf.mxu0 }
 0xe3c   :  { %v685_v17 = vadd.f32 %v681_v16, %v1515_v7 }
 0xe3d   :  { %v1354_v18 = vpop.f32.mrf.mxu0 }
 0xe3e   :  { %1416 = vtanh.f32 %v685_v17  ;;  %v1291_v20 = vmul.f32 -1.442695, %v685_v17  ;;  %v1179_v18 = vld [vmem:[%s1647_s4] sm:$0xff] }
 0xe3f   :  { %1365 = vmatprep.subr.mxu1 %v1179_v18 }
 0xe40   :  { %1418 = vpow2.f32 %v1291_v20 }
 0xe4b   :  { %v1417_v19 = vpop.eup %1416 }
 0xe4c   :  { %695 = vrot.lane.b32.xlu0 %v1417_v19, %s1442_s2 }
 0xe4d   :  { %v1419_v21 = vpop.eup %1418 }
 0xe4e   :  { %v689_v22 = vadd.f32 1.0, %v1419_v21 }
 0xe50   :  { %1420 = vrcp.f32 %v689_v22 }
 0xe5d   :  { %v1421_v23 = vpop.eup %1420 }
 0xe5e   :  { %v693_v2 = vmul.f32 %v1421_v23, %v603_v1 }
 0xebe   :  { %v696_v24 = vpop.permute.xlu0 %695 }
 0xebf   :  { %v698_v25 = vmul.f32 %v1421_v23, %v696_v24 }
 0xec1   :  { %700 = vrot.lane.b32.xlu1 %v698_v25, %s1443_s3 }
 0xf33   :  { %v701_v0 = vpop.permute.xlu1 %700 }
 0xf34   :  { %v703_v26 = vadd.f32 %v701_v0, %v693_v2 }
 0xf36   :  { %1422 = vtanh.f32 %v703_v26 }
 0xf43   :  { %v1423_v27 = vpop.eup %1422 }
 0xf44   :  { %706 = vrot.lane.b32.xlu0 %v1423_v27, %s1443_s3 }
 0xfb6   :  { %v707_v28 = vpop.permute.xlu0 %706 }
 0xfb7   :  { %v709_v29 = vmul.f32 %v1421_v23, %v707_v28 }
 0xfb9   :  { %v1028_v30 = vrot.slane %v709_v29, %v1531_v44  ;;  %711 = vrot.lane.b32.xlu1 %v709_v29, %s1444_s27 }
 0xfbb   :  { %v1029_v31 = vcombine.high %v1028_v30, %v1028_v30  ;;  %v1036_v32 = vrot.slane %v1028_v30, %v1531_v44 }
 0xfbd   :  { %v1043_v33 = vrot.slane %v1029_v31, %v1531_v44  ;;  %v1132_v34 = vrot.slane %v1036_v32, %v1534_v48 }
 0xfbf   :  { %v1136_v35 = vrot.slane %v1043_v33, %v1534_v48  ;;  %v1171_v36 = vsel %vm1170_vm7, %v1168_v13, %v1132_v34 }
 0xfc1   :  { %v1172_v37 = vsel %vm1170_vm7, %v1169_v14, %v1136_v35 }
0x102b   :  { %v712_v38 = vpop.permute.xlu1 %711 }
0x102c   :  { %1358 = vmatmul.mubr.msk.f32.vlgmr.msra.gmra.mxu1 %vm111_vm3, %v712_v38 }
0x102d   :  { %1366 = vmatpush3.msra.mxu1 %v1179_v18 }
0x10ec   :  { %v781_v39 = vpop.f32.mrf.mxu1 }
0x10ed   :  { %v785_v40 = vadd.f32 %v781_v39, %v1515_v7 }
0x10ee   :  { %v1359_v41 = vpop.f32.mrf.mxu1 }
0x10ef   :  { %1424 = vtanh.f32 %v785_v40  ;;  %v1293_v43 = vmul.f32 -1.442695, %v785_v40 }
0x10f1   :  { %1426 = vpow2.f32 %v1293_v43 }
0x10fc   :  { %v1425_v42 = vpop.eup %1424 }
0x10fd   :  { %795 = vrot.lane.b32.xlu0 %v1425_v42, %s1442_s2 }
0x10fe   :  { %v1427_v45 = vpop.eup %1426 }
0x10ff   :  { %v789_v46 = vadd.f32 1.0, %v1427_v45 }
0x1101   :  { %1428 = vrcp.f32 %v789_v46 }
0x110e   :  { %v1429_v47 = vpop.eup %1428 }
0x110f   :  { %v793_v51 = vmul.f32 %v1429_v47, %v703_v26 }
0x116f   :  { %v796_v49 = vpop.permute.xlu0 %795 }
0x1170   :  { %v798_v50 = vmul.f32 %v1429_v47, %v796_v49 }
0x1172   :  { %800 = vrot.lane.b32.xlu1 %v798_v50, %s1443_s3 }
0x11e4   :  { %v801_v52 = vpop.permute.xlu1 %800 }
0x11e5   :  { %v803_v53 = vadd.f32 %v801_v52, %v793_v51 }
0x11e7   :  { %1430 = vtanh.f32 %v803_v53 }
0x11f4   :  { %v1431_v54 = vpop.eup %1430 }
0x11f5   :  { %806 = vrot.lane.b32.xlu0 %v1431_v54, %s1443_s3 }
0x1267   :  { %v807_v55 = vpop.permute.xlu0 %806 }
0x1268   :  { %v809_v56 = vmul.f32 %v1429_v47, %v807_v55 }
0x126a   :  { %v1050_v57 = vrot.slane %v809_v56, %v1531_v44  ;;  %811 = vrot.lane.b32.xlu1 %v809_v56, %s1444_s27 }
0x126c   :  { %v1051_v58 = vcombine.high %v1050_v57, %v1050_v57  ;;  %v1058_v59 = vrot.slane %v1050_v57, %v1531_v44 }
0x126e   :  { %v1065_v60 = vrot.slane %v1051_v58, %v1531_v44  ;;  %v1142_v61 = vrot.slane %v1058_v59, %v1534_v48 }
0x1270   :  { %v1174_v62 = vsel %vm1173_vm8, %v1171_v36, %v1142_v61  ;;  %v1146_v63 = vrot.slane %v1065_v60, %v1534_v48 }
0x1272   :  { %v1175_v1 = vsel %vm1173_vm8, %v1172_v37, %v1146_v63 }
0x12dc   :  { %v812_v3 = vpop.permute.xlu1 %811 }
0x12dd   :  { %1363 = vmatmul.mubr.msk.f32.vlgmr.msra.gmra.mxu0 %vm111_vm3, %v812_v3 }
0x139d   :  { %v881_v4 = vpop.f32.mrf.mxu0 }
0x139e   :  { %v885_v5 = vadd.f32 %v881_v4, %v1515_v7 }
0x139f   :  { %v1364_v6 = vpop.f32.mrf.mxu0 }
0x13a0   :  { %1432 = vtanh.f32 %v885_v5  ;;  %v1295_v9 = vmul.f32 -1.442695, %v885_v5 }
0x13a2   :  { %1434 = vpow2.f32 %v1295_v9 }
0x13ad   :  { %v1433_v8 = vpop.eup %1432 }
0x13ae   :  { %895 = vrot.lane.b32.xlu0 %v1433_v8, %s1442_s2 }
0x13af   :  { %v1435_v10 = vpop.eup %1434 }
0x13b0   :  { %v889_v11 = vadd.f32 1.0, %v1435_v10 }
0x13b2   :  { %1436 = vrcp.f32 %v889_v11 }
0x13bf   :  { %v1437_v12 = vpop.eup %1436 }
0x13c0   :  { %v893_v15 = vmul.f32 %v1437_v12, %v803_v53 }
0x1420   :  { %v896_v13 = vpop.permute.xlu0 %895 }
0x1421   :  { %v898_v14 = vmul.f32 %v1437_v12, %v896_v13 }
0x1423   :  { %900 = vrot.lane.b32.xlu1 %v898_v14, %s1443_s3 }
0x1495   :  { %v901_v16 = vpop.permute.xlu1 %900 }
0x1496   :  { %v903_v17 = vadd.f32 %v901_v16, %v893_v15 }
0x1498   :  { %1438 = vtanh.f32 %v903_v17 }
0x14a5   :  { %v1439_v7 = vpop.eup %1438 }
0x14a6   :  { %906 = vrot.lane.b32.xlu0 %v1439_v7, %s1443_s3 }
0x1518   :  { %v907_v19 = vpop.permute.xlu0 %906 }
0x1519   :  { %v909_v20 = vmul.f32 %v1437_v12, %v907_v19 }
0x151b   :  { %v1073_v21 = vrot.slane %v909_v20, %v1531_v44 }
0x151d   :  { %v1074_v22 = vcombine.high %v1073_v21, %v1073_v21  ;;  %v1081_v23 = vrot.slane %v1073_v21, %v1531_v44 }
0x151f   :  { %v1088_v24 = vrot.slane %v1074_v22, %v1531_v44  ;;  %v1152_v25 = vrot.slane %v1081_v23, %v1534_v48  ;;  %v1296_v44 = vld [vmem:[%s1648_s5] ss:$0 sm:$0xff] }
0x1521   :  { %v1177_v2 = vsel %vm1176_vm9, %v1174_v62, %v1152_v25  ;;  %v1156_v0 = vrot.slane %v1088_v24, %v1534_v48 }
0x1522   :  { %1189 = vrot.lane.b32.xlu1 %v1177_v2, %s1444_s27 }
0x1523   :  { %v1178_v26 = vsel %vm1176_vm9, %v1175_v1, %v1156_v0 }
0x1524   :  { %1191 = vrot.lane.b32.xlu0 %v1178_v26, %s1444_s27 }
0x1594   :  { %v1190_v27 = vpop.permute.xlu1 %1189 }
0x1595   :  { %1367 = vmatprep.mubr.msk.f32.mxu1 %vm111_vm3, %v1190_v27 }
0x1596   :  { %v1192_v28 = vpop.permute.xlu0 %1191 }
0x1597   :  { %1368 = vmatmul.mubr.msk.f32.vlgmr.msra.gmra.mxu1 %vm111_vm3, %v1192_v28 }
0x1657   :  { %v1369_v29 = vpop.f32.mrf.mxu1 }
0x1658   :  { %v1269_v30 = vadd.f32 %v1369_v29, %v1296_v44 }
0x1659   :  { %v1263_v31 = vpop.f32.mrf.mxu1 }
0x165a   :  { %1273 = vst.msk [vmem:[%s1649_s6 + $0x8] sm:$0xff] %vm32_vm1, %v1269_v30  ;;  %v1264_v48 = vadd.f32 %v1296_v44, %v1263_v31 }
0x165c   :  { %1272 = vst.msk [vmem:[%s1649_s6] sm:$0xff] %vm32_vm1, %v1264_v48 }

</bundles_post_ra>
